<compile_context>
chip_gen: v7x
topology: tpu7x:2x2x1
jax: 0.10.0
libtpu: 0.0.40
codegen_flags: <defaults>
</compile_context>

<pallas_src>
import functools

import jax
import jax.numpy as jnp
from jax.experimental import pallas as pl
from jax.experimental.pallas import tpu as pltpu


def _round_up(x, m):
    return ((x + m - 1) // m) * m


def _sep_critic_kernel(x_ref, w1_ref, b1_ref, w2_ref, b2_ref, out_ref, *,
                       num_channels, hidden):
    x = x_ref[...]                                       # (tb, D) bf16
    for c in range(num_channels):                        # static unroll, C small
        lo = c * hidden                                  # lane-aligned (multiple of 512)
        # ---- layer 1, one channel slab: (tb, D) @ (D, H) on the MXU ----------
        hc = jnp.dot(x, w1_ref[:, lo:lo + hidden],
                     preferred_element_type=jnp.float32)              # (tb, H) f32
        hc = jnp.maximum(hc + b1_ref[:, lo:lo + hidden], 0.0)
        # ---- layer 2: VPU multiply + lane reduce, consumed immediately -------
        vc = jnp.sum(hc * w2_ref[:, lo:lo + hidden], axis=-1,
                     keepdims=True)                                    # (tb, 1) f32
        out_ref[:, c:c + 1] = (vc + b2_ref[c]).astype(out_ref.dtype)


def sep_critic_forward(obs, action, params, *, block_b=None):
    """obs: (B, obs_dim), action: (B, action_dim) -> values (B, C) f32."""
    w1, b1, w2, b2 = params                  # (D, C*H), (1, C*H), (C, H), (C,)
    B, obs_dim = obs.shape
    action_dim = action.shape[1]
    D = obs_dim + action_dim
    C, H = w2.shape
    CH = C * H
    assert w1.shape == (D, CH) and b1.shape == (1, CH) and b2.shape == (C,)

    # Single K=D matmul input: concat in the wrapper; bf16 for the MXU operands.
    x = jnp.concatenate([obs, action], axis=-1).astype(jnp.bfloat16)   # (B, D)
    w1_bf = w1.astype(jnp.bfloat16)
    b1_f32 = b1.astype(jnp.float32)
    w2_flat = w2.reshape(1, CH).astype(jnp.float32)                    # lane-flat
    b2_f32 = b2.astype(jnp.float32)

    if block_b is None:
        if B <= 16:
            block_b = B
        else:
            # >= 2 "parallel" steps so both v7x TensorCores get work; cap at
            # 512 rows to amortize per-step overhead while staying well inside
            # the scoped VMEM budget (slab working set ~1 MiB at 512 rows).
            block_b = min(512, _round_up(pl.cdiv(B, 2), 8))
    grid = (pl.cdiv(B, block_b),)

    kernel = functools.partial(_sep_critic_kernel, num_channels=C, hidden=H)

    return pl.pallas_call(
        kernel,
        out_shape=jax.ShapeDtypeStruct((B, C), jnp.float32),
        grid_spec=pltpu.PrefetchScalarGridSpec(
            num_scalar_prefetch=0,
            grid=grid,
            in_specs=[
                pl.BlockSpec((block_b, D), lambda i: (i, 0)),       # x tile
                pl.BlockSpec((D, CH), lambda i: (0, 0)),            # fused W1 (resident)
                pl.BlockSpec((1, CH), lambda i: (0, 0)),            # fused b1 (resident)
                pl.BlockSpec((1, CH), lambda i: (0, 0)),            # lane-flat w2
                pl.BlockSpec(memory_space=pltpu.MemorySpace.SMEM),  # b2 scalars
            ],
            out_specs=pl.BlockSpec((block_b, C), lambda i: (i, 0)), # lane-contiguous (B, C)
        ),
        compiler_params=pltpu.CompilerParams(
            dimension_semantics=("parallel",),
            vmem_limit_bytes=32 * 1024 * 1024),
    )(x, w1_bf, b1_f32, w2_flat, b2_f32)


def init_params(key, obs_dim, action_dim, reward_channels, hidden_size=512):
    """PyTorch-Linear-style U(-1/sqrt(fan_in), +) init for C separate 2-layer
    MLPs, stored directly in the fused kernel layout (f32 master copies)."""
    D = obs_dim + action_dim
    C, H = reward_channels, hidden_size
    k1, k2, k3, k4 = jax.random.split(key, 4)
    bound1 = 1.0 / jnp.sqrt(jnp.float32(D))
    bound2 = 1.0 / jnp.sqrt(jnp.float32(H))
    w1 = jax.random.uniform(k1, (D, C * H), jnp.float32, -bound1, bound1)
    b1 = jax.random.uniform(k2, (1, C * H), jnp.float32, -bound1, bound1)
    w2 = jax.random.uniform(k3, (C, H), jnp.float32, -bound2, bound2)
    b2 = jax.random.uniform(k4, (C,), jnp.float32, -bound2, bound2)
    return w1, b1, w2, b2


def _reference_forward(obs, action, params):
    """Pure-JAX f32 reference of SepCritic.forward (C independent MLPs)."""
    w1, b1, w2, b2 = params
    x = jnp.concatenate([obs, action], axis=-1).astype(jnp.float32)
    h = jnp.maximum(x @ w1 + b1, 0.0)                        # (B, C*H)
    C, H = w2.shape
    h = h.reshape(x.shape[0], C, H)
    return jnp.einsum("bch,ch->bc", h, w2) + b2[None, :]     # (B, C)


if __name__ == "__main__":
    # Small, deterministic config consistent with the module's __init__:
    obs_dim = 24
    action_dim = 8
    skill_channels = 4
    use_sac = True
    separate_sac_reward = True            # module-level flag in the original code
    ext_r_dim = 1
    hidden_size = 512                     # hardcoded in the SeparateValueHead call
    batch = 8

    reward_channels = skill_channels + (1 if (separate_sac_reward and use_sac) else 0)
    reward_channels += ext_r_dim          # -> 6

    key = jax.random.PRNGKey(0)
    k_obs, k_act, k_par = jax.random.split(key, 3)
    obs = jax.random.normal(k_obs, (batch, obs_dim), jnp.float32)
    action = jax.random.normal(k_act, (batch, action_dim), jnp.float32)
    params = init_params(k_par, obs_dim, action_dim, reward_channels, hidden_size)

    values = jax.jit(sep_critic_forward)(obs, action, params)
    values = jax.block_until_ready(values)

    ref = _reference_forward(obs, action, params)
    assert values.shape == (batch, reward_channels), values.shape
    # bf16 MXU operands vs f32 reference -> loosened tolerance.
    assert jnp.allclose(values, ref, atol=2e-2, rtol=2e-2), \
        f"max err {jnp.max(jnp.abs(values - ref))}"

    # Ragged-batch check (B not a multiple of block_b): padded rows are masked
    # on writeback and the per-row compute never mixes rows.
    batch2 = 10
    obs2 = jax.random.normal(jax.random.PRNGKey(1), (batch2, obs_dim), jnp.float32)
    act2 = jax.random.normal(jax.random.PRNGKey(2), (batch2, action_dim), jnp.float32)
    v2 = jax.jit(functools.partial(sep_critic_forward, block_b=8))(obs2, act2, params)
    v2 = jax.block_until_ready(v2)
    ref2 = _reference_forward(obs2, act2, params)
    assert v2.shape == (batch2, reward_channels), v2.shape
    assert jnp.allclose(v2, ref2, atol=2e-2, rtol=2e-2), \
        f"max err (ragged) {jnp.max(jnp.abs(v2 - ref2))}"

    print("KERNEL_OK")
</pallas_src>

<mosaic_0001>
module attributes {stable_mosaic.version = 11 : i64} {
  func.func @_sep_critic_kernel(%arg0: i32, %arg1: memref<8x32xbf16, #tpu.memory_space<vmem>>, %arg2: memref<32x3072xbf16, #tpu.memory_space<vmem>>, %arg3: memref<1x3072xf32, #tpu.memory_space<vmem>>, %arg4: memref<1x3072xf32, #tpu.memory_space<vmem>>, %arg5: memref<6xf32, #tpu.memory_space<smem>>, %arg6: memref<8x6xf32, #tpu.memory_space<vmem>>) attributes {dimension_semantics = [#tpu.dimension_semantics<parallel>], iteration_bounds = array<i64: 1>, scalar_prefetch = 0 : i64, scratch_operands = 0 : i64, tpu.core_type = #tpu.core_type<tc>, window_params = [{transform_indices = @transform_0, window_bounds = array<i64: 8, 32>}, {pipeline_mode = #tpu.pipeline_mode<synchronous>, transform_indices = @transform_1, window_bounds = array<i64: 32, 3072>}, {pipeline_mode = #tpu.pipeline_mode<synchronous>, transform_indices = @transform_2, window_bounds = array<i64: 1, 3072>}, {pipeline_mode = #tpu.pipeline_mode<synchronous>, transform_indices = @transform_3, window_bounds = array<i64: 1, 3072>}, {transform_indices = @transform_4, window_bounds = array<i64: 6>}, {transform_indices = @transform_5, window_bounds = array<i64: 8, 6>}]} {
    %c0 = arith.constant 0 : index
    %c0_0 = arith.constant 0 : index
    %0 = vector.load %arg1[%c0, %c0_0] : memref<8x32xbf16, #tpu.memory_space<vmem>>, vector<8x32xbf16>
    %c0_1 = arith.constant 0 : index
    %c0_2 = arith.constant 0 : index
    %1 = vector.load %arg2[%c0_1, %c0_2] : memref<32x3072xbf16, #tpu.memory_space<vmem>>, vector<32x512xbf16>
    %cst = arith.constant dense<0.000000e+00> : vector<8x512xf32>
    %2 = tpu.matmul %0, %1, %cst {dimension_numbers = #tpu.dot_dimension_numbers<[1], [0], [0], [1], [0, 0, 1, 1], [], []>} : vector<8x32xbf16>, vector<32x512xbf16>, vector<8x512xf32> -> vector<8x512xf32>
    %c0_3 = arith.constant 0 : index
    %c0_4 = arith.constant 0 : index
    %3 = vector.load %arg3[%c0_3, %c0_4] : memref<1x3072xf32, #tpu.memory_space<vmem>>, vector<1x512xf32>
    %4 = vector.broadcast %3 : vector<1x512xf32> to vector<8x512xf32>
    %5 = arith.addf %2, %4 : vector<8x512xf32>
    %cst_5 = arith.constant 0.000000e+00 : f32
    %6 = vector.broadcast %cst_5 : f32 to vector<8x512xf32>
    %7 = arith.maximumf %5, %6 : vector<8x512xf32>
    %c0_6 = arith.constant 0 : index
    %c0_7 = arith.constant 0 : index
    %8 = vector.load %arg4[%c0_6, %c0_7] : memref<1x3072xf32, #tpu.memory_space<vmem>>, vector<1x512xf32>
    %9 = vector.broadcast %8 : vector<1x512xf32> to vector<8x512xf32>
    %10 = arith.mulf %7, %9 : vector<8x512xf32>
    %cst_8 = arith.constant dense<0.000000e+00> : vector<8xf32>
    %11 = vector.multi_reduction <add>, %10, %cst_8 [1] : vector<8x512xf32> to vector<8xf32>
    %12 = vector.shape_cast %11 : vector<8xf32> to vector<8x1xf32>
    %c0_9 = arith.constant 0 : index
    %13 = memref.load %arg5[%c0_9] : memref<6xf32, #tpu.memory_space<smem>>
    %14 = vector.broadcast %13 : f32 to vector<8x1xf32>
    %15 = arith.addf %12, %14 : vector<8x1xf32>
    %c0_10 = arith.constant 0 : index
    %c0_11 = arith.constant 0 : index
    %16 = vector.load %arg6[%c0_10, %c0_11] : memref<8x6xf32, #tpu.memory_space<vmem>>, vector<8x1xf32>
    tpu.vector_store %arg6[%c0_10, %c0_11], %15 {strides = array<i32>} : memref<8x6xf32, #tpu.memory_space<vmem>>, vector<8x1xf32>,
    %c0_12 = arith.constant 0 : index
    %c512 = arith.constant 512 : index
    %17 = vector.load %arg2[%c0_12, %c512] : memref<32x3072xbf16, #tpu.memory_space<vmem>>, vector<32x512xbf16>
    %cst_13 = arith.constant dense<0.000000e+00> : vector<8x512xf32>
    %18 = tpu.matmul %0, %17, %cst_13 {dimension_numbers = #tpu.dot_dimension_numbers<[1], [0], [0], [1], [0, 0, 1, 1], [], []>} : vector<8x32xbf16>, vector<32x512xbf16>, vector<8x512xf32> -> vector<8x512xf32>
    %c0_14 = arith.constant 0 : index
    %c512_15 = arith.constant 512 : index
    %19 = vector.load %arg3[%c0_14, %c512_15] : memref<1x3072xf32, #tpu.memory_space<vmem>>, vector<1x512xf32>
    %20 = vector.broadcast %19 : vector<1x512xf32> to vector<8x512xf32>
    %21 = arith.addf %18, %20 : vector<8x512xf32>
    %cst_16 = arith.constant 0.000000e+00 : f32
    %22 = vector.broadcast %cst_16 : f32 to vector<8x512xf32>
    %23 = arith.maximumf %21, %22 : vector<8x512xf32>
    %c0_17 = arith.constant 0 : index
    %c512_18 = arith.constant 512 : index
    %24 = vector.load %arg4[%c0_17, %c512_18] : memref<1x3072xf32, #tpu.memory_space<vmem>>, vector<1x512xf32>
    %25 = vector.broadcast %24 : vector<1x512xf32> to vector<8x512xf32>
    %26 = arith.mulf %23, %25 : vector<8x512xf32>
    %cst_19 = arith.constant dense<0.000000e+00> : vector<8xf32>
    %27 = vector.multi_reduction <add>, %26, %cst_19 [1] : vector<8x512xf32> to vector<8xf32>
    %28 = vector.shape_cast %27 : vector<8xf32> to vector<8x1xf32>
    %c1 = arith.constant 1 : index
    %29 = memref.load %arg5[%c1] : memref<6xf32, #tpu.memory_space<smem>>
    %30 = vector.broadcast %29 : f32 to vector<8x1xf32>
    %31 = arith.addf %28, %30 : vector<8x1xf32>
    %c0_20 = arith.constant 0 : index
    %c1_21 = arith.constant 1 : index
    %32 = vector.load %arg6[%c0_20, %c1_21] : memref<8x6xf32, #tpu.memory_space<vmem>>, vector<8x1xf32>
    tpu.vector_store %arg6[%c0_20, %c1_21], %31 {strides = array<i32>} : memref<8x6xf32, #tpu.memory_space<vmem>>, vector<8x1xf32>,
    %c0_22 = arith.constant 0 : index
    %c1024 = arith.constant 1024 : index
    %33 = vector.load %arg2[%c0_22, %c1024] : memref<32x3072xbf16, #tpu.memory_space<vmem>>, vector<32x512xbf16>
    %cst_23 = arith.constant dense<0.000000e+00> : vector<8x512xf32>
    %34 = tpu.matmul %0, %33, %cst_23 {dimension_numbers = #tpu.dot_dimension_numbers<[1], [0], [0], [1], [0, 0, 1, 1], [], []>} : vector<8x32xbf16>, vector<32x512xbf16>, vector<8x512xf32> -> vector<8x512xf32>
    %c0_24 = arith.constant 0 : index
    %c1024_25 = arith.constant 1024 : index
    %35 = vector.load %arg3[%c0_24, %c1024_25] : memref<1x3072xf32, #tpu.memory_space<vmem>>, vector<1x512xf32>
    %36 = vector.broadcast %35 : vector<1x512xf32> to vector<8x512xf32>
    %37 = arith.addf %34, %36 : vector<8x512xf32>
    %cst_26 = arith.constant 0.000000e+00 : f32
    %38 = vector.broadcast %cst_26 : f32 to vector<8x512xf32>
    %39 = arith.maximumf %37, %38 : vector<8x512xf32>
    %c0_27 = arith.constant 0 : index
    %c1024_28 = arith.constant 1024 : index
    %40 = vector.load %arg4[%c0_27, %c1024_28] : memref<1x3072xf32, #tpu.memory_space<vmem>>, vector<1x512xf32>
    %41 = vector.broadcast %40 : vector<1x512xf32> to vector<8x512xf32>
    %42 = arith.mulf %39, %41 : vector<8x512xf32>
    %cst_29 = arith.constant dense<0.000000e+00> : vector<8xf32>
    %43 = vector.multi_reduction <add>, %42, %cst_29 [1] : vector<8x512xf32> to vector<8xf32>
    %44 = vector.shape_cast %43 : vector<8xf32> to vector<8x1xf32>
    %c2 = arith.constant 2 : index
    %45 = memref.load %arg5[%c2] : memref<6xf32, #tpu.memory_space<smem>>
    %46 = vector.broadcast %45 : f32 to vector<8x1xf32>
    %47 = arith.addf %44, %46 : vector<8x1xf32>
    %c0_30 = arith.constant 0 : index
    %c2_31 = arith.constant 2 : index
    %48 = vector.load %arg6[%c0_30, %c2_31] : memref<8x6xf32, #tpu.memory_space<vmem>>, vector<8x1xf32>
    tpu.vector_store %arg6[%c0_30, %c2_31], %47 {strides = array<i32>} : memref<8x6xf32, #tpu.memory_space<vmem>>, vector<8x1xf32>,
    %c0_32 = arith.constant 0 : index
    %c1536 = arith.constant 1536 : index
    %49 = vector.load %arg2[%c0_32, %c1536] : memref<32x3072xbf16, #tpu.memory_space<vmem>>, vector<32x512xbf16>
    %cst_33 = arith.constant dense<0.000000e+00> : vector<8x512xf32>
    %50 = tpu.matmul %0, %49, %cst_33 {dimension_numbers = #tpu.dot_dimension_numbers<[1], [0], [0], [1], [0, 0, 1, 1], [], []>} : vector<8x32xbf16>, vector<32x512xbf16>, vector<8x512xf32> -> vector<8x512xf32>
    %c0_34 = arith.constant 0 : index
    %c1536_35 = arith.constant 1536 : index
    %51 = vector.load %arg3[%c0_34, %c1536_35] : memref<1x3072xf32, #tpu.memory_space<vmem>>, vector<1x512xf32>
    %52 = vector.broadcast %51 : vector<1x512xf32> to vector<8x512xf32>
    %53 = arith.addf %50, %52 : vector<8x512xf32>
    %cst_36 = arith.constant 0.000000e+00 : f32
    %54 = vector.broadcast %cst_36 : f32 to vector<8x512xf32>
    %55 = arith.maximumf %53, %54 : vector<8x512xf32>
    %c0_37 = arith.constant 0 : index
    %c1536_38 = arith.constant 1536 : index
    %56 = vector.load %arg4[%c0_37, %c1536_38] : memref<1x3072xf32, #tpu.memory_space<vmem>>, vector<1x512xf32>
    %57 = vector.broadcast %56 : vector<1x512xf32> to vector<8x512xf32>
    %58 = arith.mulf %55, %57 : vector<8x512xf32>
    %cst_39 = arith.constant dense<0.000000e+00> : vector<8xf32>
    %59 = vector.multi_reduction <add>, %58, %cst_39 [1] : vector<8x512xf32> to vector<8xf32>
    %60 = vector.shape_cast %59 : vector<8xf32> to vector<8x1xf32>
    %c3 = arith.constant 3 : index
    %61 = memref.load %arg5[%c3] : memref<6xf32, #tpu.memory_space<smem>>
    %62 = vector.broadcast %61 : f32 to vector<8x1xf32>
    %63 = arith.addf %60, %62 : vector<8x1xf32>
    %c0_40 = arith.constant 0 : index
    %c3_41 = arith.constant 3 : index
    %64 = vector.load %arg6[%c0_40, %c3_41] : memref<8x6xf32, #tpu.memory_space<vmem>>, vector<8x1xf32>
    tpu.vector_store %arg6[%c0_40, %c3_41], %63 {strides = array<i32>} : memref<8x6xf32, #tpu.memory_space<vmem>>, vector<8x1xf32>,
    %c0_42 = arith.constant 0 : index
    %c2048 = arith.constant 2048 : index
    %65 = vector.load %arg2[%c0_42, %c2048] : memref<32x3072xbf16, #tpu.memory_space<vmem>>, vector<32x512xbf16>
    %cst_43 = arith.constant dense<0.000000e+00> : vector<8x512xf32>
    %66 = tpu.matmul %0, %65, %cst_43 {dimension_numbers = #tpu.dot_dimension_numbers<[1], [0], [0], [1], [0, 0, 1, 1], [], []>} : vector<8x32xbf16>, vector<32x512xbf16>, vector<8x512xf32> -> vector<8x512xf32>
    %c0_44 = arith.constant 0 : index
    %c2048_45 = arith.constant 2048 : index
    %67 = vector.load %arg3[%c0_44, %c2048_45] : memref<1x3072xf32, #tpu.memory_space<vmem>>, vector<1x512xf32>
    %68 = vector.broadcast %67 : vector<1x512xf32> to vector<8x512xf32>
    %69 = arith.addf %66, %68 : vector<8x512xf32>
    %cst_46 = arith.constant 0.000000e+00 : f32
    %70 = vector.broadcast %cst_46 : f32 to vector<8x512xf32>
    %71 = arith.maximumf %69, %70 : vector<8x512xf32>
    %c0_47 = arith.constant 0 : index
    %c2048_48 = arith.constant 2048 : index
    %72 = vector.load %arg4[%c0_47, %c2048_48] : memref<1x3072xf32, #tpu.memory_space<vmem>>, vector<1x512xf32>
    %73 = vector.broadcast %72 : vector<1x512xf32> to vector<8x512xf32>
    %74 = arith.mulf %71, %73 : vector<8x512xf32>
    %cst_49 = arith.constant dense<0.000000e+00> : vector<8xf32>
    %75 = vector.multi_reduction <add>, %74, %cst_49 [1] : vector<8x512xf32> to vector<8xf32>
    %76 = vector.shape_cast %75 : vector<8xf32> to vector<8x1xf32>
    %c4 = arith.constant 4 : index
    %77 = memref.load %arg5[%c4] : memref<6xf32, #tpu.memory_space<smem>>
    %78 = vector.broadcast %77 : f32 to vector<8x1xf32>
    %79 = arith.addf %76, %78 : vector<8x1xf32>
    %c0_50 = arith.constant 0 : index
    %c4_51 = arith.constant 4 : index
    %80 = vector.load %arg6[%c0_50, %c4_51] : memref<8x6xf32, #tpu.memory_space<vmem>>, vector<8x1xf32>
    tpu.vector_store %arg6[%c0_50, %c4_51], %79 {strides = array<i32>} : memref<8x6xf32, #tpu.memory_space<vmem>>, vector<8x1xf32>,
    %c0_52 = arith.constant 0 : index
    %c2560 = arith.constant 2560 : index
    %81 = vector.load %arg2[%c0_52, %c2560] : memref<32x3072xbf16, #tpu.memory_space<vmem>>, vector<32x512xbf16>
    %cst_53 = arith.constant dense<0.000000e+00> : vector<8x512xf32>
    %82 = tpu.matmul %0, %81, %cst_53 {dimension_numbers = #tpu.dot_dimension_numbers<[1], [0], [0], [1], [0, 0, 1, 1], [], []>} : vector<8x32xbf16>, vector<32x512xbf16>, vector<8x512xf32> -> vector<8x512xf32>
    %c0_54 = arith.constant 0 : index
    %c2560_55 = arith.constant 2560 : index
    %83 = vector.load %arg3[%c0_54, %c2560_55] : memref<1x3072xf32, #tpu.memory_space<vmem>>, vector<1x512xf32>
    %84 = vector.broadcast %83 : vector<1x512xf32> to vector<8x512xf32>
    %85 = arith.addf %82, %84 : vector<8x512xf32>
    %cst_56 = arith.constant 0.000000e+00 : f32
    %86 = vector.broadcast %cst_56 : f32 to vector<8x512xf32>
    %87 = arith.maximumf %85, %86 : vector<8x512xf32>
    %c0_57 = arith.constant 0 : index
    %c2560_58 = arith.constant 2560 : index
    %88 = vector.load %arg4[%c0_57, %c2560_58] : memref<1x3072xf32, #tpu.memory_space<vmem>>, vector<1x512xf32>
    %89 = vector.broadcast %88 : vector<1x512xf32> to vector<8x512xf32>
    %90 = arith.mulf %87, %89 : vector<8x512xf32>
    %cst_59 = arith.constant dense<0.000000e+00> : vector<8xf32>
    %91 = vector.multi_reduction <add>, %90, %cst_59 [1] : vector<8x512xf32> to vector<8xf32>
    %92 = vector.shape_cast %91 : vector<8xf32> to vector<8x1xf32>
    %c5 = arith.constant 5 : index
    %93 = memref.load %arg5[%c5] : memref<6xf32, #tpu.memory_space<smem>>
    %94 = vector.broadcast %93 : f32 to vector<8x1xf32>
    %95 = arith.addf %92, %94 : vector<8x1xf32>
    %c0_60 = arith.constant 0 : index
    %c5_61 = arith.constant 5 : index
    %96 = vector.load %arg6[%c0_60, %c5_61] : memref<8x6xf32, #tpu.memory_space<vmem>>, vector<8x1xf32>
    tpu.vector_store %arg6[%c0_60, %c5_61], %95 {strides = array<i32>} : memref<8x6xf32, #tpu.memory_space<vmem>>, vector<8x1xf32>,
    return
  }
  func.func @transform_0(%arg0: i32) -> (i32, i32) {
    %c0_i32 = arith.constant 0 : i32
    %c0_i32_0 = arith.constant 0 : i32
    return %arg0, %c0_i32 : i32, i32
  }
  func.func @transform_1(%arg0: i32) -> (i32, i32) {
    %c0_i32 = arith.constant 0 : i32
    %c0_i32_0 = arith.constant 0 : i32
    %c0_i32_1 = arith.constant 0 : i32
    return %c0_i32, %c0_i32_0 : i32, i32
  }
  func.func @transform_2(%arg0: i32) -> (i32, i32) {
    %c0_i32 = arith.constant 0 : i32
    %c0_i32_0 = arith.constant 0 : i32
    %c0_i32_1 = arith.constant 0 : i32
    return %c0_i32, %c0_i32_0 : i32, i32
  }
  func.func @transform_3(%arg0: i32) -> (i32, i32) {
    %c0_i32 = arith.constant 0 : i32
    %c0_i32_0 = arith.constant 0 : i32
    %c0_i32_1 = arith.constant 0 : i32
    return %c0_i32, %c0_i32_0 : i32, i32
  }
  func.func @transform_4(%arg0: i32) -> i32 {
    %c0_i32 = arith.constant 0 : i32
    %c0_i32_0 = arith.constant 0 : i32
    return %c0_i32 : i32
  }
  func.func @transform_5(%arg0: i32) -> (i32, i32) {
    %c0_i32 = arith.constant 0 : i32
    %c0_i32_0 = arith.constant 0 : i32
    return %arg0, %c0_i32 : i32, i32
  }
}

</mosaic_0001>

<bundles_post_ra>
// kernel: sep_critic_forward.1
= control target key start
LH: loop header
LB: loop body
LE: loop exit
PB: predicated region body
PF: predicated region fallthrough
CT: control target
= control target key end

     0   :  { %10 = vsyncpa [#allocation4], 0  ;;  %s1638_s0 = inlined_call_operand.vmem [shape: bf16[8,32], index: 0, kind: input, shape index: {}]   ;;  %s1639_s1 = inlined_call_operand.vmem [shape: bf16[32,3072], index: 1, kind: input, shape index: {}]   ;;  %s1640_s2 = inlined_call_operand.vmem [shape: f32[1,3072], index: 2, kind: input, shape index: {}]   ;;  %s1641_s3 = inlined_call_operand.vmem [shape: f32[1,3072], index: 3, kind: input, shape index: {}]   ;;  %s1642_s4 = inlined_call_operand.vmem [shape: f32[6], index: 4, kind: input, shape index: {}]   ;;  %s1643_s5 = inlined_call_operand.hbm [shape: f32[8,6], index: 5, kind: output, shape index: {}]  }
   0x1   :  { %11 = vsyncpa [#allocation3], 0  ;;  %s26_s20 = sshll.u32 %s1642_s4, 4  ;;  %s27_s20 = int_to_ptr.vmem [resolvable:$true] %s26_s20 }
   0x2   :  { %s1275_s21 = scalar_lea.vmem %s27_s20, 16  ;;  %p1280_p1 = scmp.lt.s32.totalorder %s27_s20, %s27_s20 }
   0x3   :  { %p1276_p0 = scmp.ne.s32.totalorder %s27_s20, %s1275_s21  ;;  %p1281_p2 = scmp.lt.s32.totalorder %s1275_s21, %s1275_s21 }
   0x5   :  { %p1282_p3 = por %p1281_p2, %p1280_p1 }
   0x7   :  { %p1283_p4 = pnand %p1282_p3, %p1276_p0 }
   0x9   :  { %1286 = shalt.err (!%p1283_p4)
}
   0xa   :  { %s1313_s22 = smov [#allocation2]  }
   0xb   :  { %29 = dma.vmem_to_smem %s27_s20, 16, %s1313_s22, [#allocation4]  }
   0xc   :  { %1309 = dma.done.wait [#allocation4], 16  }
   0xd   :  { %1310 = vsyncadd [#allocation4], 4294967280 }
   0xe   :  { %33 = sfence }
   0xf   :  { %v36_v0 = vld [vmem:[%s1639_s1] sm:$0xff]  ;;  %v37_v2 = vld [vmem:[%s1639_s1 + $0x8] sm:$0xff]  ;;  %v1314_v8 = vmov 0   ;;  %v232_v15 = vld [vmem:[%s1639_s1 + $0x10] sm:$0xff]  ;;  %vm106_vm0 = vcmask 261120   ;;  %s1227_s9 = sld [smem:[#allocation2 + $0x1]] }
  0x10   :  { %v38_v1 = vld [vmem:[%s1639_s1 + $0x60] sm:$0xff]  ;;  %v39_v5 = vld [vmem:[%s1639_s1 + $0x68] sm:$0xff]  ;;  %142 = vmatprep.mubr.bf16.mxu0 %v1314_v8  ;;  %183 = vmatprep.mubr.bf16.mxu1 %v1314_v8  ;;  %v234_v16 = vld [vmem:[%s1639_s1 + $0x70] sm:$0xff]  ;;  %vm230_vm1 = vcmask 7168   ;;  %s1238_s10 = sld [smem:[#allocation2 + $0x2]]  ;;  %vm422_vm2 = vcmask 15368  }
  0x11   :  { %v1208_v3 = vcombine.high %v36_v0, %v38_v1  ;;  %v1207_v4 = vcombine.low %v36_v0, %v38_v1  ;;  %v40_v6 = vld [vmem:[%s1639_s1 + $0xc0] sm:$0xff]  ;;  %v1210_v9 = vcombine.high %v37_v2, %v39_v5  ;;  %v1209_v10 = vcombine.low %v37_v2, %v39_v5  ;;  %v41_v12 = vld [vmem:[%s1639_s1 + $0xc8] sm:$0xff]  ;;  %v233_v17 = vld [vmem:[%s1639_s1 + $0x18] sm:$0xff]  ;;  %s1249_s11 = sld [smem:[#allocation2 + $0x3]]  ;;  %s1260_s12 = sld [smem:[#allocation2 + $0x4]] }
  0x12   :  { %v42_v7 = vld [vmem:[%s1639_s1 + $0x120] sm:$0xff]  ;;  %v43_v13 = vld [vmem:[%s1639_s1 + $0x128] sm:$0xff]  ;;  %v235_v19 = vld [vmem:[%s1639_s1 + $0x78] sm:$0xff]  ;;  %v1218_v21 = vcombine.high %v232_v15, %v234_v16  ;;  %v1217_v28 = vcombine.low %v232_v15, %v234_v16  ;;  %vm614_vm3 = vcmask 23568   ;;  %vm806_vm4 = vcmask 31768   ;;  %s1271_s13 = sld [smem:[#allocation2 + $0x5]] }
  0x13   :  { %v1212_v11 = vcombine.high %v40_v6, %v42_v7  ;;  %110 = vmatprep.subr.bf16.mxu0 %v1208_v3  ;;  %v1214_v14 = vcombine.high %v41_v12, %v43_v13  ;;  %151 = vmatprep.subr.bf16.mxu1 %v1210_v9  ;;  %v1211_v18 = vcombine.low %v40_v6, %v42_v7  ;;  %v236_v23 = vld [vmem:[%s1639_s1 + $0xd0] sm:$0xff]  ;;  %v237_v25 = vld [vmem:[%s1639_s1 + $0xd8] sm:$0xff]  ;;  %v1402_v27 = vld [vmem:[%s1638_s0] sm:$0xf]  ;;  %vm998_vm5 = vcmask 39968  }
  0x14   :  { %111 = vmatpush1.bf16.msra.mxu0 %v1207_v4  ;;  %152 = vmatpush1.bf16.msra.mxu1 %v1209_v10  ;;  %v1213_v20 = vcombine.low %v41_v12, %v43_v13  ;;  %v1220_v22 = vcombine.high %v233_v17, %v235_v19  ;;  %v238_v24 = vld [vmem:[%s1639_s1 + $0x130] sm:$0xff]  ;;  %v239_v26 = vld [vmem:[%s1639_s1 + $0x138] sm:$0xff]  ;;  %v1219_v29 = vcombine.low %v233_v17, %v235_v19  ;;  %v424_v32 = vld [vmem:[%s1639_s1 + $0x20] sm:$0xff]  ;;  %vm1190_vm6 = vcmask 48168  }
  0x15   :  { %112 = vmatprep.subr.bf16.mxu0 %v1212_v11  ;;  %153 = vmatprep.subr.bf16.mxu1 %v1214_v14  ;;  %v1222_v30 = vcombine.high %v236_v23, %v238_v24  ;;  %v1224_v31 = vcombine.high %v237_v25, %v239_v26  ;;  %v426_v33 = vld [vmem:[%s1639_s1 + $0x80] sm:$0xff]  ;;  %v425_v34 = vld [vmem:[%s1639_s1 + $0x28] sm:$0xff]  ;;  %v1221_v36 = vcombine.low %v236_v23, %v238_v24  ;;  %v616_v48 = vld [vmem:[%s1639_s1 + $0x30] sm:$0xff] }
  0x16   :  { %v427_v35 = vld [vmem:[%s1639_s1 + $0x88] sm:$0xff]  ;;  %v1223_v37 = vcombine.low %v237_v25, %v239_v26  ;;  %v1229_v38 = vcombine.high %v424_v32, %v426_v33  ;;  %v428_v40 = vld [vmem:[%s1639_s1 + $0xe0] sm:$0xff]  ;;  %v1228_v44 = vcombine.low %v424_v32, %v426_v33  ;;  %v618_v49 = vld [vmem:[%s1639_s1 + $0x90] sm:$0xff] }
  0x17   :  { %v1231_v39 = vcombine.high %v425_v34, %v427_v35  ;;  %v430_v41 = vld [vmem:[%s1639_s1 + $0x140] sm:$0xff]  ;;  %v429_v42 = vld [vmem:[%s1639_s1 + $0xe8] sm:$0xff]  ;;  %v1230_v45 = vcombine.low %v425_v34, %v427_v35  ;;  %v617_v50 = vld [vmem:[%s1639_s1 + $0x38] sm:$0xff]  ;;  %v1240_v54 = vcombine.high %v616_v48, %v618_v49  ;;  %v1239_v60 = vcombine.low %v616_v48, %v618_v49 }
  0x18   :  { %113 = vmatpush1.bf16.msra.mxu0 %v1211_v18  ;;  %154 = vmatpush1.bf16.msra.mxu1 %v1213_v20  ;;  %v431_v43 = vld [vmem:[%s1639_s1 + $0x148] sm:$0xff]  ;;  %v1233_v46 = vcombine.high %v428_v40, %v430_v41  ;;  %v619_v51 = vld [vmem:[%s1639_s1 + $0x98] sm:$0xff]  ;;  %v1232_v52 = vcombine.low %v428_v40, %v430_v41  ;;  %v620_v56 = vld [vmem:[%s1639_s1 + $0xf0] sm:$0xff] }
  0x19   :  { %302 = vmatprep.subr.bf16.mxu0 %v1218_v21  ;;  %343 = vmatprep.subr.bf16.mxu1 %v1220_v22  ;;  %v1235_v47 = vcombine.high %v429_v42, %v431_v43  ;;  %v1234_v53 = vcombine.low %v429_v42, %v431_v43  ;;  %v1242_v55 = vcombine.high %v617_v50, %v619_v51  ;;  %v622_v57 = vld [vmem:[%s1639_s1 + $0x150] sm:$0xff]  ;;  %v621_v58 = vld [vmem:[%s1639_s1 + $0xf8] sm:$0xff]  ;;  %v808_v0 = vld [vmem:[%s1639_s1 + $0x40] sm:$0xff] }
  0x1a   :  { %v623_v59 = vld [vmem:[%s1639_s1 + $0x158] sm:$0xff]  ;;  %v1241_v61 = vcombine.low %v617_v50, %v619_v51  ;;  %v1244_v62 = vcombine.high %v620_v56, %v622_v57  ;;  %v810_v1 = vld [vmem:[%s1639_s1 + $0xa0] sm:$0xff]  ;;  %v809_v2 = vld [vmem:[%s1639_s1 + $0x48] sm:$0xff]  ;;  %v1243_v4 = vcombine.low %v620_v56, %v622_v57 }
  0x1b   :  { %1215 = vmatmul.mubr.msk.bf16.vlgmr.msra.gmra.mrb[0].mxu0 %vm106_vm0, %v1402_v27  ;;  %1216 = vmatmul.mubr.msk.bf16.vlgmr.msra.gmra.mrb[0].mxu1 %vm106_vm0, %v1402_v27  ;;  %v1246_v63 = vcombine.high %v621_v58, %v623_v59  ;;  %v811_v3 = vld [vmem:[%s1639_s1 + $0xa8] sm:$0xff]  ;;  %v1245_v5 = vcombine.low %v621_v58, %v623_v59  ;;  %v1251_v6 = vcombine.high %v808_v0, %v810_v1  ;;  %v812_v9 = vld [vmem:[%s1639_s1 + $0x100] sm:$0xff]  ;;  %v1000_v17 = vld [vmem:[%s1639_s1 + $0x50] sm:$0xff] }
  0x1c   :  { %303 = vmatpush1.bf16.msra.mxu0 %v1217_v28  ;;  %344 = vmatpush1.bf16.msra.mxu1 %v1219_v29  ;;  %v1253_v7 = vcombine.high %v809_v2, %v811_v3  ;;  %v814_v10 = vld [vmem:[%s1639_s1 + $0x160] sm:$0xff]  ;;  %v813_v11 = vld [vmem:[%s1639_s1 + $0x108] sm:$0xff]  ;;  %v1250_v13 = vcombine.low %v808_v0, %v810_v1  ;;  %v1252_v14 = vcombine.low %v809_v2, %v811_v3  ;;  %v1002_v18 = vld [vmem:[%s1639_s1 + $0xb0] sm:$0xff] }
  0x1d   :  { %304 = vmatprep.subr.bf16.mxu0 %v1222_v30  ;;  %345 = vmatprep.subr.bf16.mxu1 %v1224_v31  ;;  %v815_v12 = vld [vmem:[%s1639_s1 + $0x168] sm:$0xff]  ;;  %v1255_v15 = vcombine.high %v812_v9, %v814_v10  ;;  %v1001_v19 = vld [vmem:[%s1639_s1 + $0x58] sm:$0xff]  ;;  %v1254_v21 = vcombine.low %v812_v9, %v814_v10  ;;  %v1262_v23 = vcombine.high %v1000_v17, %v1002_v18  ;;  %v1004_v25 = vld [vmem:[%s1639_s1 + $0x110] sm:$0xff] }
  0x1e   :  { %334 = vmatprep.mubr.bf16.mxu0 %v1314_v8  ;;  %375 = vmatprep.mubr.bf16.mxu1 %v1314_v8  ;;  %v1257_v16 = vcombine.high %v813_v11, %v815_v12  ;;  %v1003_v20 = vld [vmem:[%s1639_s1 + $0xb8] sm:$0xff]  ;;  %v1256_v22 = vcombine.low %v813_v11, %v815_v12  ;;  %v1006_v26 = vld [vmem:[%s1639_s1 + $0x170] sm:$0xff]  ;;  %v1261_v30 = vcombine.low %v1000_v17, %v1002_v18  ;;  %v240_v57 = vld [vmem:[%s1640_s2 + $0x4] sm:$0xf] }
  0x1f   :  { %v1264_v24 = vcombine.high %v1001_v19, %v1003_v20  ;;  %v1005_v28 = vld [vmem:[%s1639_s1 + $0x118] sm:$0xff]  ;;  %v1263_v31 = vcombine.low %v1001_v19, %v1003_v20  ;;  %v1266_v32 = vcombine.high %v1004_v25, %v1006_v26  ;;  %v1265_v34 = vcombine.low %v1004_v25, %v1006_v26  ;;  %v388_v9 = vld [vmem:[%s1641_s3 + $0x4] sm:$0xf]  ;;  %v432_v26 = vld [vmem:[%s1640_s2 + $0x8] sm:$0xf] }
  0x20   :  { %305 = vmatpush1.bf16.msra.mxu0 %v1221_v36  ;;  %346 = vmatpush1.bf16.msra.mxu1 %v1223_v37  ;;  %v1007_v29 = vld [vmem:[%s1639_s1 + $0x178] sm:$0xff]  ;;  %v46_v36 = vlaneseq  ;;  %s1315_s1 = smov [#allocation5]  }
  0x21   :  { %494 = vmatprep.subr.bf16.mxu0 %v1229_v38  ;;  %535 = vmatprep.subr.bf16.mxu1 %v1231_v39  ;;  %v1268_v33 = vcombine.high %v1005_v28, %v1007_v29  ;;  %v1267_v35 = vcombine.low %v1005_v28, %v1007_v29  ;;  %v44_v39 = vld [vmem:[%s1640_s2] sm:$0xf]  ;;  %s1198_s14 = sshll.u32 %s1315_s1, 4  ;;  %s1199_s14 = int_to_ptr.vmem [resolvable:$true] %s1198_s14 }
  0x22   :  { %v47_v37 = vshrl.u32 %v46_v36, 7  ;;  %s1287_s15 = scalar_lea.vmem %s1199_s14, 128  ;;  %p1292_p6 = scmp.lt.s32.totalorder %s1199_s14, %s1199_s14 }
  0x23   :  { %1225 = vmatmul.mubr.msk.bf16.vlgmr.msra.gmra.mrb[4].mxu0 %vm106_vm0, %v1402_v27  ;;  %1226 = vmatmul.mubr.msk.bf16.vlgmr.msra.gmra.mrb[4].mxu1 %vm106_vm0, %v1402_v27  ;;  %p1288_p5 = scmp.ne.s32.totalorder %s1199_s14, %s1287_s15  ;;  %p1293_p7 = scmp.lt.s32.totalorder %s1287_s15, %s1287_s15 }
  0x24   :  { %495 = vmatpush1.bf16.msra.mxu0 %v1228_v44  ;;  %536 = vmatpush1.bf16.msra.mxu1 %v1230_v45  ;;  %v1534_v38 = vsub.s32 0, %v47_v37  ;;  %v1539_v40 = vsub.s32 1, %v47_v37  ;;  %v1541_v41 = vsub.s32 2, %v47_v37 }
  0x25   :  { %496 = vmatprep.subr.bf16.mxu0 %v1233_v46  ;;  %537 = vmatprep.subr.bf16.mxu1 %v1235_v47  ;;  %p1294_p8 = por %p1293_p7, %p1292_p6 }
  0x26   :  { %526 = vmatprep.mubr.bf16.mxu0 %v1314_v8  ;;  %567 = vmatprep.mubr.bf16.mxu1 %v1314_v8  ;;  %v49_v42 = vrot.slane %v44_v39, %v1534_v38  ;;  %v53_v43 = vrot.slane %v44_v39, %v1539_v40  ;;  %v57_v44 = vrot.slane %v44_v39, %v1541_v41 }
  0x27   :  { %v245_v2 = vrot.slane %v240_v57, %v1534_v38  ;;  %v249_v3 = vrot.slane %v240_v57, %v1539_v40  ;;  %v253_v10 = vrot.slane %v240_v57, %v1541_v41  ;;  %v397_v17 = vrot.slane %v388_v9, %v1539_v40  ;;  %p1295_p9 = pnand %p1294_p8, %p1288_p5 }
  0x28   :  { %497 = vmatpush1.bf16.msra.mxu0 %v1232_v52  ;;  %538 = vmatpush1.bf16.msra.mxu1 %v1234_v53  ;;  %v401_v19 = vrot.slane %v388_v9, %v1541_v41 }
  0x29   :  { %686 = vmatprep.subr.bf16.mxu0 %v1240_v54  ;;  %727 = vmatprep.subr.bf16.mxu1 %v1242_v55 }
  0x2b   :  { %1236 = vmatmul.mubr.msk.bf16.vlgmr.msra.gmra.mrb[8].mxu0 %vm106_vm0, %v1402_v27  ;;  %1237 = vmatmul.mubr.msk.bf16.vlgmr.msra.gmra.mrb[8].mxu1 %vm106_vm0, %v1402_v27 }
  0x2c   :  { %687 = vmatpush1.bf16.msra.mxu0 %v1239_v60  ;;  %728 = vmatpush1.bf16.msra.mxu1 %v1241_v61 }
  0x2d   :  { %688 = vmatprep.subr.bf16.mxu0 %v1244_v62  ;;  %729 = vmatprep.subr.bf16.mxu1 %v1246_v63 }
  0x2e   :  { %718 = vmatprep.mubr.bf16.mxu0 %v1314_v8  ;;  %759 = vmatprep.mubr.bf16.mxu1 %v1314_v8 }
  0x30   :  { %689 = vmatpush1.bf16.msra.mxu0 %v1243_v4  ;;  %730 = vmatpush1.bf16.msra.mxu1 %v1245_v5 }
  0x31   :  { %878 = vmatprep.subr.bf16.mxu0 %v1251_v6  ;;  %919 = vmatprep.subr.bf16.mxu1 %v1253_v7 }
  0x33   :  { %1247 = vmatmul.mubr.msk.bf16.vlgmr.msra.gmra.mrb[12].mxu0 %vm106_vm0, %v1402_v27  ;;  %1248 = vmatmul.mubr.msk.bf16.vlgmr.msra.gmra.mrb[12].mxu1 %vm106_vm0, %v1402_v27 }
  0x34   :  { %879 = vmatpush1.bf16.msra.mxu0 %v1250_v13  ;;  %920 = vmatpush1.bf16.msra.mxu1 %v1252_v14 }
  0x35   :  { %880 = vmatprep.subr.bf16.mxu0 %v1255_v15  ;;  %921 = vmatprep.subr.bf16.mxu1 %v1257_v16  ;;  %v393_v15 = vrot.slane %v388_v9, %v1534_v38 }
  0x36   :  { %910 = vmatprep.mubr.bf16.mxu0 %v1314_v8  ;;  %951 = vmatprep.mubr.bf16.mxu1 %v1314_v8 }
  0x38   :  { %881 = vmatpush1.bf16.msra.mxu0 %v1254_v21  ;;  %922 = vmatpush1.bf16.msra.mxu1 %v1256_v22 }
  0x39   :  { %1070 = vmatprep.subr.bf16.mxu0 %v1262_v23  ;;  %1111 = vmatprep.subr.bf16.mxu1 %v1264_v24 }
  0x3b   :  { %1258 = vmatmul.mubr.msk.bf16.vlgmr.msra.gmra.mrb[16].mxu0 %vm106_vm0, %v1402_v27  ;;  %1259 = vmatmul.mubr.msk.bf16.vlgmr.msra.gmra.mrb[16].mxu1 %vm106_vm0, %v1402_v27 }
  0x3c   :  { %1071 = vmatpush1.bf16.msra.mxu0 %v1261_v30  ;;  %1112 = vmatpush1.bf16.msra.mxu1 %v1263_v31 }
  0x3d   :  { %1072 = vmatprep.subr.bf16.mxu0 %v1266_v32  ;;  %1113 = vmatprep.subr.bf16.mxu1 %v1268_v33 }
  0x3e   :  { %1102 = vmatprep.mubr.bf16.mxu0 %v1314_v8  ;;  %1143 = vmatprep.mubr.bf16.mxu1 %v1314_v8  ;;  %v1543_v8 = vsub.s32 3, %v47_v37 }
  0x40   :  { %1073 = vmatpush1.bf16.msra.mxu0 %v1265_v34  ;;  %1114 = vmatpush1.bf16.msra.mxu1 %v1267_v35  ;;  %v61_v45 = vrot.slane %v44_v39, %v1543_v8  ;;  %v257_v11 = vrot.slane %v240_v57, %v1543_v8  ;;  %v405_v37 = vrot.slane %v388_v9, %v1543_v8 }
  0x41   :  { %v437_v39 = vrot.slane %v432_v26, %v1534_v38 }
  0x43   :  { %1269 = vmatmul.mubr.msk.bf16.vlgmr.msra.gmra.mrb[20].mxu0 %vm106_vm0, %v1402_v27  ;;  %1270 = vmatmul.mubr.msk.bf16.vlgmr.msra.gmra.mrb[20].mxu1 %vm106_vm0, %v1402_v27  ;;  %v196_v27 = vld [vmem:[%s1641_s3] sm:$0xf] }
  0x44   :  { %v201_v48 = vrot.slane %v196_v27, %v1534_v38  ;;  %v205_v52 = vrot.slane %v196_v27, %v1539_v40  ;;  %v209_v54 = vrot.slane %v196_v27, %v1541_v41  ;;  %v213_v4 = vrot.slane %v196_v27, %v1543_v8 }
  0xee   :  { %v144_v46 = vpop.f32.mrb[0].mxu0  ;;  %v185_v50 = vpop.f32.mrb[0].mxu1 }
  0xef   :  { %v145_v47 = vadd.f32 %v144_v46, %v49_v42  ;;  %v146_v49 = vpop.f32.mrb[1].mxu0  ;;  %v186_v53 = vadd.f32 %v185_v50, %v57_v44  ;;  %v187_v56 = vpop.f32.mrb[1].mxu1  ;;  %v441_v42 = vrot.slane %v432_v26, %v1539_v40  ;;  %v445_v46 = vrot.slane %v432_v26, %v1541_v41 }
  0xf0   :  { %v147_v51 = vadd.f32 %v146_v49, %v53_v43  ;;  %v148_v55 = vpop.f32.mrb[2].mxu0  ;;  %v188_v59 = vadd.f32 %v187_v56, %v61_v45  ;;  %v189_v61 = vpop.f32.mrb[2].mxu1  ;;  %v580_v45 = vld [vmem:[%s1641_s3 + $0x8] sm:$0xf] }
  0xf1   :  { %v192_v58 = vmax.f32 %v145_v47, 0.0  ;;  %v149_v60 = vpop.f32.mrb[3].mxu0  ;;  %v194_v63 = vmax.f32 %v186_v53, 0.0  ;;  %v190_v0 = vpop.f32.mrb[3].mxu1  ;;  %v449_v47 = vrot.slane %v432_v26, %v1543_v8  ;;  %v589_v53 = vrot.slane %v580_v45, %v1539_v40 }
  0xf2   :  { %v193_v62 = vmax.f32 %v147_v51, 0.0  ;;  %v195_v7 = vmax.f32 %v188_v59, 0.0  ;;  %v585_v51 = vrot.slane %v580_v45, %v1534_v38  ;;  %v593_v55 = vrot.slane %v580_v45, %v1541_v41 }
  0xf3   :  { %v218_v1 = vmul.f32 %v201_v48, %v192_v58  ;;  %v220_v6 = vmul.f32 %v209_v54, %v194_v63 }
  0xf4   :  { %v219_v5 = vmul.f32 %v205_v52, %v193_v62  ;;  %v221_v24 = vmul.f32 %v213_v4, %v195_v7  ;;  %v624_v62 = vld [vmem:[%s1640_s2 + $0xc] sm:$0xf] }
  0xf5   :  { %v629_v9 = vrot.slane %v624_v62, %v1534_v38 }
  0xf6   :  { %v336_v12 = vpop.f32.mrb[4].mxu0  ;;  %v222_v13 = vadd.f32 %v219_v5, %v218_v1  ;;  %v377_v18 = vpop.f32.mrb[4].mxu1 }
  0xf7   :  { %v337_v14 = vadd.f32 %v336_v12, %v245_v2  ;;  %v338_v16 = vpop.f32.mrb[5].mxu0  ;;  %v378_v21 = vadd.f32 %v377_v18, %v253_v10  ;;  %v379_v23 = vpop.f32.mrb[5].mxu1  ;;  %v633_v10 = vrot.slane %v624_v62, %v1539_v40 }
  0xf8   :  { %v339_v20 = vadd.f32 %v338_v16, %v249_v3  ;;  %v340_v22 = vpop.f32.mrb[6].mxu0  ;;  %v223_v25 = vadd.f32 %v222_v13, %v220_v6  ;;  %v380_v29 = vadd.f32 %v379_v23, %v257_v11  ;;  %v381_v31 = vpop.f32.mrb[6].mxu1  ;;  %v597_v11 = vrot.slane %v580_v45, %v1543_v8 }
  0xf9   :  { %v384_v28 = vmax.f32 %v337_v14, 0.0  ;;  %v341_v30 = vpop.f32.mrb[7].mxu0  ;;  %v386_v33 = vmax.f32 %v378_v21, 0.0  ;;  %v382_v34 = vpop.f32.mrb[7].mxu1  ;;  %v637_v16 = vrot.slane %v624_v62, %v1541_v41 }
  0xfa   :  { %v385_v32 = vmax.f32 %v339_v20, 0.0  ;;  %v224_v35 = vadd.f32 %v223_v25, %v221_v24  ;;  %v387_v44 = vmax.f32 %v380_v29, 0.0 }
  0xfb   :  { %v410_v36 = vmul.f32 %v393_v15, %v384_v28  ;;  %v412_v43 = vmul.f32 %v401_v19, %v386_v33  ;;  %v772_v15 = vld [vmem:[%s1641_s3 + $0xc] sm:$0xf]  ;;  %v816_v33 = vld [vmem:[%s1640_s2 + $0x10] sm:$0xf] }
  0xfc   :  { %v411_v27 = vmul.f32 %v397_v17, %v385_v32  ;;  %225 = vadd.xlane.f32.xlu0 %v224_v35  ;;  %v413_v56 = vmul.f32 %v405_v37, %v387_v44  ;;  %v641_v17 = vrot.slane %v624_v62, %v1543_v8  ;;  %v777_v21 = vrot.slane %v772_v15, %v1534_v38 }
  0xfd   :  { %v781_v23 = vrot.slane %v772_v15, %v1539_v40  ;;  %v785_v25 = vrot.slane %v772_v15, %v1541_v41  ;;  %v789_v45 = vrot.slane %v772_v15, %v1543_v8 }
  0xfe   :  { %v414_v48 = vadd.f32 %v411_v27, %v410_v36  ;;  %v528_v49 = vpop.f32.mrb[8].mxu0  ;;  %v569_v54 = vpop.f32.mrb[8].mxu1 }
  0xff   :  { %v529_v50 = vadd.f32 %v528_v49, %v437_v39  ;;  %v530_v52 = vpop.f32.mrb[9].mxu0  ;;  %v570_v58 = vadd.f32 %v569_v54, %v445_v46  ;;  %v571_v60 = vpop.f32.mrb[9].mxu1  ;;  %v821_v46 = vrot.slane %v816_v33, %v1534_v38 }
 0x100   :  { %v531_v57 = vadd.f32 %v530_v52, %v441_v42  ;;  %v532_v59 = vpop.f32.mrb[10].mxu0  ;;  %v415_v61 = vadd.f32 %v414_v48, %v412_v43  ;;  %v572_v0 = vadd.f32 %v571_v60, %v449_v47  ;;  %v573_v2 = vpop.f32.mrb[10].mxu1  ;;  %v825_v47 = vrot.slane %v816_v33, %v1539_v40 }
 0x101   :  { %v576_v63 = vmax.f32 %v529_v50, 0.0  ;;  %v533_v1 = vpop.f32.mrb[11].mxu0  ;;  %v578_v4 = vmax.f32 %v570_v58, 0.0  ;;  %v574_v5 = vpop.f32.mrb[11].mxu1  ;;  %v829_v52 = vrot.slane %v816_v33, %v1541_v41 }
 0x102   :  { %v577_v3 = vmax.f32 %v531_v57, 0.0  ;;  %v416_v6 = vadd.f32 %v415_v61, %v413_v56  ;;  %v579_v14 = vmax.f32 %v572_v0, 0.0 }
 0x103   :  { %v602_v7 = vmul.f32 %v585_v51, %v576_v63  ;;  %v604_v13 = vmul.f32 %v593_v55, %v578_v4  ;;  %v964_v51 = vld [vmem:[%s1641_s3 + $0x10] sm:$0xf]  ;;  %v1008_v4 = vld [vmem:[%s1640_s2 + $0x14] sm:$0xf] }
 0x104   :  { %v603_v12 = vmul.f32 %v589_v53, %v577_v3  ;;  %417 = vadd.xlane.f32.xlu0 %v416_v6  ;;  %v605_v31 = vmul.f32 %v597_v11, %v579_v14  ;;  %v833_v53 = vrot.slane %v816_v33, %v1543_v8  ;;  %v969_v57 = vrot.slane %v964_v51, %v1534_v38 }
 0x105   :  { %v973_v59 = vrot.slane %v964_v51, %v1539_v40  ;;  %v977_v61 = vrot.slane %v964_v51, %v1541_v41  ;;  %v981_v15 = vrot.slane %v964_v51, %v1543_v8 }
 0x106   :  { %v720_v18 = vpop.f32.mrb[12].mxu0  ;;  %v606_v19 = vadd.f32 %v603_v12, %v602_v7  ;;  %v761_v24 = vpop.f32.mrb[12].mxu1 }
 0x107   :  { %v721_v20 = vadd.f32 %v720_v18, %v629_v9  ;;  %v722_v22 = vpop.f32.mrb[13].mxu0  ;;  %v762_v28 = vadd.f32 %v761_v24, %v637_v16  ;;  %v763_v30 = vpop.f32.mrb[13].mxu1  ;;  %v1013_v16 = vrot.slane %v1008_v4, %v1534_v38 }
 0x108   :  { %v723_v26 = vadd.f32 %v722_v22, %v633_v10  ;;  %v724_v29 = vpop.f32.mrb[14].mxu0  ;;  %v607_v32 = vadd.f32 %v606_v19, %v604_v13  ;;  %v764_v35 = vadd.f32 %v763_v30, %v641_v17  ;;  %v765_v37 = vpop.f32.mrb[14].mxu1  ;;  %v1017_v17 = vrot.slane %v1008_v4, %v1539_v40 }
 0x109   :  { %v768_v34 = vmax.f32 %v721_v20, 0.0  ;;  %v725_v36 = vpop.f32.mrb[15].mxu0  ;;  %v770_v42 = vmax.f32 %v762_v28, 0.0  ;;  %v766_v27 = vpop.f32.mrb[15].mxu1  ;;  %v1021_v22 = vrot.slane %v1008_v4, %v1541_v41 }
 0x10a   :  { %v769_v39 = vmax.f32 %v723_v26, 0.0  ;;  %v608_v43 = vadd.f32 %v607_v32, %v605_v31  ;;  %v771_v50 = vmax.f32 %v764_v35, 0.0 }
 0x10b   :  { %v794_v44 = vmul.f32 %v777_v21, %v768_v34  ;;  %v796_v49 = vmul.f32 %v785_v25, %v770_v42  ;;  %v1156_v21 = vld [vmem:[%s1641_s3 + $0x14] sm:$0xf]  ;;  %s227_s3 = sld [smem:[#allocation2]] }
 0x10c   :  { %v795_v48 = vmul.f32 %v781_v23, %v769_v39  ;;  %609 = vadd.xlane.f32.xlu1 %v608_v43  ;;  %v797_v62 = vmul.f32 %v789_v45, %v771_v50  ;;  %v1025_v23 = vrot.slane %v1008_v4, %v1543_v8  ;;  %v1161_v28 = vrot.slane %v1156_v21, %v1534_v38 }
 0x10d   :  { %v1165_v30 = vrot.slane %v1156_v21, %v1539_v40  ;;  %v1169_v32 = vrot.slane %v1156_v21, %v1541_v41  ;;  %v1173_v41 = vrot.slane %v1156_v21, %v1543_v8  ;;  %v612_v8 = vstv %s1238_s10 }
 0x10e   :  { %v798_v54 = vadd.f32 %v795_v48, %v794_v44  ;;  %v912_v55 = vpop.f32.mrb[16].mxu0  ;;  %v953_v60 = vpop.f32.mrb[16].mxu1 }
 0x10f   :  { %v913_v56 = vadd.f32 %v912_v55, %v821_v46  ;;  %v914_v58 = vpop.f32.mrb[17].mxu0  ;;  %v954_v0 = vadd.f32 %v953_v60, %v829_v52  ;;  %v955_v2 = vpop.f32.mrb[17].mxu1 }
 0x110   :  { %v915_v63 = vadd.f32 %v914_v58, %v825_v47  ;;  %v916_v1 = vpop.f32.mrb[18].mxu0  ;;  %v799_v3 = vadd.f32 %v798_v54, %v796_v49  ;;  %v956_v6 = vadd.f32 %v955_v2, %v833_v53  ;;  %v957_v9 = vpop.f32.mrb[18].mxu1  ;;  %v420_v58 = vstv %s1227_s9 }
 0x111   :  { %v960_v5 = vmax.f32 %v913_v56, 0.0  ;;  %v917_v7 = vpop.f32.mrb[19].mxu0  ;;  %v962_v11 = vmax.f32 %v954_v0, 0.0  ;;  %v958_v12 = vpop.f32.mrb[19].mxu1  ;;  %v228_v55 = vstv %s227_s3  ;;  %v996_v2 = vstv %s1260_s12 }
 0x112   :  { %v961_v10 = vmax.f32 %v915_v63, 0.0  ;;  %v800_v13 = vadd.f32 %v799_v3, %v797_v62  ;;  %v963_v20 = vmax.f32 %v956_v6, 0.0  ;;  %v804_v63 = vstv %s1249_s11 }
 0x113   :  { %v986_v14 = vmul.f32 %v969_v57, %v960_v5  ;;  %v988_v19 = vmul.f32 %v977_v61, %v962_v11  ;;  %v1188_v5 = vstv %s1271_s13 }
 0x114   :  { %v987_v18 = vmul.f32 %v973_v59, %v961_v10  ;;  %801 = vadd.xlane.f32.xlu1 %v800_v13  ;;  %v989_v33 = vmul.f32 %v981_v15, %v963_v20 }
 0x116   :  { %v990_v24 = vadd.f32 %v987_v18, %v986_v14  ;;  %v1104_v25 = vpop.f32.mrb[20].mxu0  ;;  %v1145_v31 = vpop.f32.mrb[20].mxu1 }
 0x117   :  { %v1105_v26 = vadd.f32 %v1104_v25, %v1013_v16  ;;  %v1106_v29 = vpop.f32.mrb[21].mxu0  ;;  %v1146_v35 = vadd.f32 %v1145_v31, %v1021_v22  ;;  %v1147_v37 = vpop.f32.mrb[21].mxu1 }
 0x118   :  { %v1107_v34 = vadd.f32 %v1106_v29, %v1017_v17  ;;  %v1108_v36 = vpop.f32.mrb[22].mxu0  ;;  %v991_v39 = vadd.f32 %v990_v24, %v988_v19  ;;  %v1148_v27 = vadd.f32 %v1147_v37, %v1025_v23  ;;  %v1149_v44 = vpop.f32.mrb[22].mxu1 }
 0x119   :  { %v1152_v42 = vmax.f32 %v1105_v26, 0.0  ;;  %v1109_v43 = vpop.f32.mrb[23].mxu0  ;;  %v1154_v46 = vmax.f32 %v1146_v35, 0.0  ;;  %v1150_v47 = vpop.f32.mrb[23].mxu1 }
 0x11a   :  { %v1153_v45 = vmax.f32 %v1107_v34, 0.0  ;;  %v992_v38 = vadd.f32 %v991_v39, %v989_v33  ;;  %v1155_v50 = vmax.f32 %v1148_v27, 0.0 }
 0x11b   :  { %v1178_v48 = vmul.f32 %v1161_v28, %v1152_v42  ;;  %v1180_v40 = vmul.f32 %v1169_v32, %v1154_v46 }
 0x11c   :  { %v1179_v49 = vmul.f32 %v1165_v30, %v1153_v45  ;;  %993 = vadd.xlane.f32.xlu0 %v992_v38  ;;  %v1181_v52 = vmul.f32 %v1173_v41, %v1155_v50 }
 0x11e   :  { %v1182_v51 = vadd.f32 %v1179_v49, %v1178_v48 }
 0x120   :  { %v1183_v53 = vadd.f32 %v1182_v51, %v1180_v40 }
 0x122   :  { %v1184_v54 = vadd.f32 %v1183_v53, %v1181_v52 }
 0x124   :  { %1185 = vadd.xlane.f32.xlu1 %v1184_v54 }
 0x189   :  { %v226_v56 = vpop.xlane.xlu0 %225 }
 0x18a   :  { %v229_v57 = vadd.f32 %v228_v55, %v226_v56 }
 0x18c   :  { %231 = vst.msk [vmem:[#allocation5] sm:$0xff] %vm230_vm1, %v229_v57 }
 0x191   :  { %v418_v59 = vpop.xlane.xlu0 %417 }
 0x192   :  { %v421_v60 = vadd.f32 %v420_v58, %v418_v59 }
 0x194   :  { %423 = vst.msk [vmem:[#allocation5] sm:$0xff] %vm422_vm2, %v421_v60 }
 0x199   :  { %v610_v61 = vpop.xlane.xlu1 %609 }
 0x19a   :  { %v613_v62 = vadd.f32 %v612_v8, %v610_v61 }
 0x19c   :  { %615 = vst.msk [vmem:[#allocation5] sm:$0xff] %vm614_vm3, %v613_v62 }
 0x1a1   :  { %v802_v0 = vpop.xlane.xlu1 %801 }
 0x1a2   :  { %v805_v1 = vadd.f32 %v804_v63, %v802_v0 }
 0x1a4   :  { %807 = vst.msk [vmem:[#allocation5] sm:$0xff] %vm806_vm4, %v805_v1 }
 0x1a9   :  { %v994_v3 = vpop.xlane.xlu0 %993 }
 0x1aa   :  { %v997_v4 = vadd.f32 %v996_v2, %v994_v3 }
 0x1ac   :  { %999 = vst.msk [vmem:[#allocation5] sm:$0xff] %vm998_vm5, %v997_v4 }
 0x1b1   :  { %v1186_v6 = vpop.xlane.xlu1 %1185 }
 0x1b2   :  { %v1189_v7 = vadd.f32 %v1188_v5, %v1186_v6 }
 0x1b4   :  { %1191 = vst.msk [vmem:[#allocation5] sm:$0xff] %vm1190_vm6, %v1189_v7 }
 0x1b5   :  { %1298 = shalt.err (!%p1295_p9)
}
 0x1b6   :  { %s1299_s18 = scalar_lea.hbm %s1643_s5, 128 }
 0x1b7   :  { %p1300_p10 = scmp.ne.s32.totalorder %s1643_s5, %s1299_s18  ;;  %p1303_p11 = scmp.lt.u32.totalorder %s1299_s18, %s1643_s5 }
 0x1b9   :  { %p1305_p12 = pnand %p1303_p11, %p1300_p10 }
 0x1bb   :  { %1308 = shalt.err (!%p1305_p12)
}
 0x1bc   :  { %1201 = dma.vmem_to_hbm [thread:$0]  %s1199_s14, 128, %s1643_s5, [#allocation3]  }
 0x1bd   :  { %1311 = dma.done.wait [#allocation3], 128  }
 0x1be   :  { %1312 = vsyncadd [#allocation3], 4294967168 }
 0x1bf   :  { %1205 = vsyncpa [#allocation3], 1 }
 0x1c0   :  { %1206 = vsyncpa [#allocation4], 1 }

</bundles_post_ra>
